<compile_context>
chip_gen: v5e
topology: v5e:2x2
jax: 0.10.0
libtpu: 0.0.40
codegen_flags: <defaults>
</compile_context>

<pallas_src>
import functools

import numpy as np
import jax
import jax.numpy as jnp
from jax import lax
from jax.experimental import pallas as pl
from jax.experimental.pallas import tpu as pltpu

LANES = 128
_BIG = 3.0e38          # min/max sentinel, safe for realistic data ranges


def _round_up(x, m):
    return ((x + m - 1) // m) * m


# ----------------------------- Pallas kernel -----------------------------
def _psnr_moments_kernel(m1_ref, m2_ref, sse_ref, mm_ref, sm_ref, *,
                         n_valid, tile_rows, num_chunks):
    """Row-chunked accumulation of per-batch min/max + raw moments; finalize SSE.

    m1_ref, m2_ref: (1, tile_rows, 128) f32 lane-dense chunk of one batch's crop.
    sse_ref:        (1, 8, 128) f32 per-batch output (broadcast scalar, unmasked store).
    mm_ref:         (8, 128) f32 scratch; rows 0..3 = running min1, max1, min2, max2.
    sm_ref:         (8, 128) f32 scratch; rows 0..4 = running sum x1, x2, x1^2, x2^2, x1*x2.
    """
    k = pl.program_id(1)
    last = num_chunks - 1

    # Static geometry of the zero-padded tail (lives entirely in the last chunk).
    last_n = n_valid - last * tile_rows * LANES      # valid elements in the last chunk
    full_rows = last_n // LANES                      # fully-valid rows in the last chunk
    tail_valid = last_n % LANES                      # valid lanes in row `full_rows`
    padded = (num_chunks * tile_rows * LANES) != n_valid

    @pl.when(k == 0)
    def _init():
        big = jnp.full((1, LANES), _BIG, dtype=jnp.float32)
        mm_ref[0:1, :] = big          # running min1
        mm_ref[1:2, :] = -big         # running max1
        mm_ref[2:3, :] = big          # running min2
        mm_ref[3:4, :] = -big         # running max2
        sm_ref[...] = jnp.zeros_like(sm_ref)

    def accum_rows(lo, hi):
        # Unmasked accumulation over rows [lo, hi) of this chunk (static bounds).
        a1 = m1_ref[0, lo:hi, :]
        a2 = m2_ref[0, lo:hi, :]
        mm_ref[0:1, :] = jnp.minimum(mm_ref[0:1, :], jnp.min(a1, axis=0, keepdims=True))
        mm_ref[1:2, :] = jnp.maximum(mm_ref[1:2, :], jnp.max(a1, axis=0, keepdims=True))
        mm_ref[2:3, :] = jnp.minimum(mm_ref[2:3, :], jnp.min(a2, axis=0, keepdims=True))
        mm_ref[3:4, :] = jnp.maximum(mm_ref[3:4, :], jnp.max(a2, axis=0, keepdims=True))
        sm_ref[0:1, :] = sm_ref[0:1, :] + jnp.sum(a1, axis=0, keepdims=True)
        sm_ref[1:2, :] = sm_ref[1:2, :] + jnp.sum(a2, axis=0, keepdims=True)
        sm_ref[2:3, :] = sm_ref[2:3, :] + jnp.sum(a1 * a1, axis=0, keepdims=True)
        sm_ref[3:4, :] = sm_ref[3:4, :] + jnp.sum(a2 * a2, axis=0, keepdims=True)
        sm_ref[4:5, :] = sm_ref[4:5, :] + jnp.sum(a1 * a2, axis=0, keepdims=True)

    def accum_tail(row, nv):
        # Masked accumulation of the single partially-valid row `row` (static index).
        t1 = m1_ref[0, row:row + 1, :]
        t2 = m2_ref[0, row:row + 1, :]
        col = lax.broadcasted_iota(jnp.int32, (1, LANES), 1)
        valid = col < nv
        mm_ref[0:1, :] = jnp.minimum(mm_ref[0:1, :], jnp.where(valid, t1, _BIG))
        mm_ref[1:2, :] = jnp.maximum(mm_ref[1:2, :], jnp.where(valid, t1, -_BIG))
        mm_ref[2:3, :] = jnp.minimum(mm_ref[2:3, :], jnp.where(valid, t2, _BIG))
        mm_ref[3:4, :] = jnp.maximum(mm_ref[3:4, :], jnp.where(valid, t2, -_BIG))
        z1 = jnp.where(valid, t1, 0.0)
        z2 = jnp.where(valid, t2, 0.0)
        sm_ref[0:1, :] = sm_ref[0:1, :] + z1
        sm_ref[1:2, :] = sm_ref[1:2, :] + z2
        sm_ref[2:3, :] = sm_ref[2:3, :] + z1 * z1
        sm_ref[3:4, :] = sm_ref[3:4, :] + z2 * z2
        sm_ref[4:5, :] = sm_ref[4:5, :] + z1 * z2

    def accum_last_chunk():
        if full_rows > 0:
            accum_rows(0, full_rows)
        if tail_valid > 0:
            accum_tail(full_rows, tail_valid)

    if num_chunks == 1:
        accum_last_chunk()
    elif not padded:
        accum_rows(0, tile_rows)
    else:
        @pl.when(k < last)
        def _body():
            accum_rows(0, tile_rows)

        @pl.when(k == last)
        def _body_last():
            accum_last_chunk()

    @pl.when(k == last)
    def _finalize():
        min1 = jnp.min(mm_ref[0:1, :])
        max1 = jnp.max(mm_ref[1:2, :])
        min2 = jnp.min(mm_ref[2:3, :])
        max2 = jnp.max(mm_ref[3:4, :])
        s1 = jnp.sum(sm_ref[0:1, :])
        s2 = jnp.sum(sm_ref[1:2, :])
        s11 = jnp.sum(sm_ref[2:3, :])
        s22 = jnp.sum(sm_ref[3:4, :])
        s12 = jnp.sum(sm_ref[4:5, :])
        # u = a*x1 + b, v = c*x2 + d  with the per-batch normalization parameters.
        inv1 = 1.0 / (max1 - min1 + 1e-8)
        inv2 = 1.0 / (max2 - min2 + 1e-8)
        a = inv1
        b = -min1 * inv1
        c = inv2
        d = -min2 * inv2
        nf = jnp.float32(n_valid)
        suu = a * a * s11 + 2.0 * a * b * s1 + nf * b * b
        svv = c * c * s22 + 2.0 * c * d * s2 + nf * d * d
        suv = a * c * s12 + a * d * s1 + b * c * s2 + nf * b * d
        sse = jnp.maximum(suu + svv - 2.0 * suv, 0.0)   # guard f32 cancellation
        sse_ref[...] = jnp.full(sse_ref.shape, sse, dtype=jnp.float32)


# ------------------------------- JAX glue --------------------------------
def _crop_masks(img1, img2, mask_pos, mask_width):
    # Faithful to the PyTorch loop: m[b] = img[b, ..., s:s+w] with s = mask_pos[b].
    # TODO(synk): lax.dynamic_slice clamps out-of-range starts to [0, W-w]; PyTorch slicing
    # would shorten/raise instead, so behavior matches only for in-range mask_pos.
    w = int(mask_width)
    pos = jnp.asarray(mask_pos, dtype=jnp.int32).reshape(-1)
    crop = lambda im, s: lax.dynamic_slice_in_dim(im, s, w, axis=-1)
    m1 = jax.vmap(crop)(img1, pos)
    m2 = jax.vmap(crop)(img2, pos)
    return m1, m2


def compute_psnr_forward(img1, img2, mask_pos, mask_width, max_val=1.0):
    m1, m2 = _crop_masks(img1, img2, mask_pos, mask_width)
    B = m1.shape[0]
    n = int(np.prod(m1.shape[1:]))                  # C * H * mask_width
    r = -(-n // LANES)                              # lane-dense rows needed
    tile_rows = min(2048, _round_up(r, 8))          # ~1 MiB f32 input block at 2048 rows
    num_chunks = -(-r // tile_rows)
    r_slab = num_chunks * tile_rows
    pad = r_slab * LANES - n

    def to_slab(m):
        # Crop -> lane-dense (B, r_slab, 128) f32 slab (pad only when needed; compiles out
        # when n is already a multiple of tile_rows*128).
        flat = m.astype(jnp.float32).reshape(B, n)
        if pad:
            flat = jnp.pad(flat, ((0, 0), (0, pad)))
        return flat.reshape(B, r_slab, LANES)

    s1 = to_slab(m1)
    s2 = to_slab(m2)

    kernel = functools.partial(_psnr_moments_kernel, n_valid=n,
                               tile_rows=tile_rows, num_chunks=num_chunks)
    sse = pl.pallas_call(
        kernel,
        out_shape=jax.ShapeDtypeStruct((B, 8, LANES), jnp.float32),
        grid=(B, num_chunks),
        in_specs=[
            pl.BlockSpec((1, tile_rows, LANES), lambda b, k: (b, k, 0)),
            pl.BlockSpec((1, tile_rows, LANES), lambda b, k: (b, k, 0)),
        ],
        out_specs=pl.BlockSpec((1, 8, LANES), lambda b, k: (b, 0, 0)),
        scratch_shapes=[
            pltpu.VMEM((8, LANES), jnp.float32),    # running min1/max1/min2/max2
            pltpu.VMEM((8, LANES), jnp.float32),    # running Sx1/Sx2/Sx1^2/Sx2^2/Sx1x2
        ],
        compiler_params=pltpu.CompilerParams(
            dimension_semantics=("parallel", "arbitrary")),
    )(s1, s2)

    total_sse = jnp.sum(sse[:, 0, 0])
    mse = total_sse / jnp.float32(B * n)
    psnr = 10.0 * jnp.log10(jnp.float32(max_val * max_val) / mse)
    return jnp.where(mse == 0.0, jnp.float32(jnp.inf), psnr)


# ---------------------------- pure-JAX reference ----------------------------
def _psnr_ref(img1, img2, mask_pos, mask_width, max_val=1.0):
    m1, m2 = _crop_masks(img1, img2, mask_pos, mask_width)
    B = m1.shape[0]
    f1 = m1.reshape(B, -1)
    f2 = m2.reshape(B, -1)
    min1 = f1.min(axis=1).reshape(B, 1, 1, 1)
    max1 = f1.max(axis=1).reshape(B, 1, 1, 1)
    min2 = f2.min(axis=1).reshape(B, 1, 1, 1)
    max2 = f2.max(axis=1).reshape(B, 1, 1, 1)
    n1 = (m1 - min1) / (max1 - min1 + 1e-8)
    n2 = (m2 - min2) / (max2 - min2 + 1e-8)
    mse = jnp.mean((n1 - n2) ** 2)
    return jnp.where(mse == 0.0, jnp.float32(jnp.inf),
                     10.0 * jnp.log10(max_val ** 2 / mse))


if __name__ == "__main__":
    key = jax.random.PRNGKey(0)
    k1, k2 = jax.random.split(key)
    B, C, H, W = 2, 4, 16, 16
    img1 = jax.random.uniform(k1, (B, C, H, W), jnp.float32)
    img2 = jax.random.uniform(k2, (B, C, H, W), jnp.float32)
    mask_pos = [2, 5]
    mask_width = 8

    val = compute_psnr_forward(img1, img2, mask_pos, mask_width)
    val = jax.block_until_ready(val)

    ref = jax.block_until_ready(_psnr_ref(img1, img2, mask_pos, mask_width))
    assert np.isfinite(np.asarray(val)), "non-finite PSNR"
    np.testing.assert_allclose(np.asarray(val), np.asarray(ref), rtol=1e-4, atol=1e-4)

    print("KERNEL_OK")
</pallas_src>

<mosaic_0001>
module attributes {stable_mosaic.version = 11 : i64} {
  func.func @_psnr_moments_kernel(%arg0: i32, %arg1: i32, %arg2: memref<1x8x128xf32, #tpu.memory_space<vmem>>, %arg3: memref<1x8x128xf32, #tpu.memory_space<vmem>>, %arg4: memref<1x8x128xf32, #tpu.memory_space<vmem>>, %arg5: memref<8x128xf32, #tpu.memory_space<vmem>>, %arg6: memref<8x128xf32, #tpu.memory_space<vmem>>) attributes {dimension_semantics = [#tpu.dimension_semantics<parallel>, #tpu.dimension_semantics<arbitrary>], iteration_bounds = array<i64: 2, 1>, scalar_prefetch = 0 : i64, scratch_operands = 2 : i64, tpu.core_type = #tpu.core_type<tc>, window_params = [{transform_indices = @transform_0, window_bounds = array<i64: 1, 8, 128>}, {transform_indices = @transform_1, window_bounds = array<i64: 1, 8, 128>}, {transform_indices = @transform_2, window_bounds = array<i64: 1, 8, 128>}]} {
    %c0_i32 = arith.constant 0 : i32
    %0 = arith.cmpi eq, %arg1, %c0_i32 : i32
    %1 = arith.extui %0 : i1 to i32
    %c0_i32_0 = arith.constant 0 : i32
    %2 = arith.cmpi ne, %1, %c0_i32_0 : i32
    scf.if %2 {
      %cst_48 = arith.constant 3.000000e+38 : f32
      %58 = vector.broadcast %cst_48 : f32 to vector<1x128xf32>
      %c0_49 = arith.constant 0 : index
      %c0_50 = arith.constant 0 : index
      %59 = vector.load %arg5[%c0_49, %c0_50] : memref<8x128xf32, #tpu.memory_space<vmem>>, vector<1x128xf32>
      tpu.vector_store %arg5[%c0_49, %c0_50], %58 {strides = array<i32>} : memref<8x128xf32, #tpu.memory_space<vmem>>, vector<1x128xf32>,
      %cst_51 = arith.constant 0.000000e+00 : f32
      %60 = vector.broadcast %cst_51 : f32 to vector<1x128xf32>
      %61 = arith.subf %60, %58 : vector<1x128xf32>
      %c1_52 = arith.constant 1 : index
      %c0_53 = arith.constant 0 : index
      %62 = vector.load %arg5[%c1_52, %c0_53] : memref<8x128xf32, #tpu.memory_space<vmem>>, vector<1x128xf32>
      tpu.vector_store %arg5[%c1_52, %c0_53], %61 {strides = array<i32>} : memref<8x128xf32, #tpu.memory_space<vmem>>, vector<1x128xf32>,
      %c2_54 = arith.constant 2 : index
      %c0_55 = arith.constant 0 : index
      %63 = vector.load %arg5[%c2_54, %c0_55] : memref<8x128xf32, #tpu.memory_space<vmem>>, vector<1x128xf32>
      tpu.vector_store %arg5[%c2_54, %c0_55], %58 {strides = array<i32>} : memref<8x128xf32, #tpu.memory_space<vmem>>, vector<1x128xf32>,
      %cst_56 = arith.constant 0.000000e+00 : f32
      %64 = vector.broadcast %cst_56 : f32 to vector<1x128xf32>
      %65 = arith.subf %64, %58 : vector<1x128xf32>
      %c3_57 = arith.constant 3 : index
      %c0_58 = arith.constant 0 : index
      %66 = vector.load %arg5[%c3_57, %c0_58] : memref<8x128xf32, #tpu.memory_space<vmem>>, vector<1x128xf32>
      tpu.vector_store %arg5[%c3_57, %c0_58], %65 {strides = array<i32>} : memref<8x128xf32, #tpu.memory_space<vmem>>, vector<1x128xf32>,
      %cst_59 = arith.constant 0.000000e+00 : f32
      %67 = vector.broadcast %cst_59 : f32 to vector<8x128xf32>
      %c0_60 = arith.constant 0 : index
      %c0_61 = arith.constant 0 : index
      %68 = vector.load %arg6[%c0_60, %c0_61] : memref<8x128xf32, #tpu.memory_space<vmem>>, vector<8x128xf32>
      tpu.vector_store %arg6[%c0_60, %c0_61], %67 {strides = array<i32>} : memref<8x128xf32, #tpu.memory_space<vmem>>, vector<8x128xf32>,
    } else {
    }
    %c0 = arith.constant 0 : index
    %c0_1 = arith.constant 0 : index
    %c0_2 = arith.constant 0 : index
    %3 = vector.load %arg2[%c0, %c0_1, %c0_2] : memref<1x8x128xf32, #tpu.memory_space<vmem>>, vector<1x4x128xf32>
    %4 = vector.shape_cast %3 : vector<1x4x128xf32> to vector<4x128xf32>
    %c0_3 = arith.constant 0 : index
    %c0_4 = arith.constant 0 : index
    %c0_5 = arith.constant 0 : index
    %5 = vector.load %arg3[%c0_3, %c0_4, %c0_5] : memref<1x8x128xf32, #tpu.memory_space<vmem>>, vector<1x4x128xf32>
    %6 = vector.shape_cast %5 : vector<1x4x128xf32> to vector<4x128xf32>
    %c0_6 = arith.constant 0 : index
    %c0_7 = arith.constant 0 : index
    %7 = vector.load %arg5[%c0_6, %c0_7] : memref<8x128xf32, #tpu.memory_space<vmem>>, vector<1x128xf32>
    %cst = arith.constant dense<0x7F800000> : vector<128xf32>
    %8 = vector.multi_reduction <minimumf>, %4, %cst [0] : vector<4x128xf32> to vector<128xf32>
    %9 = vector.shape_cast %8 : vector<128xf32> to vector<1x128xf32>
    %10 = arith.minimumf %7, %9 : vector<1x128xf32>
    %c0_8 = arith.constant 0 : index
    %c0_9 = arith.constant 0 : index
    %11 = vector.load %arg5[%c0_8, %c0_9] : memref<8x128xf32, #tpu.memory_space<vmem>>, vector<1x128xf32>
    tpu.vector_store %arg5[%c0_8, %c0_9], %10 {strides = array<i32>} : memref<8x128xf32, #tpu.memory_space<vmem>>, vector<1x128xf32>,
    %c1 = arith.constant 1 : index
    %c0_10 = arith.constant 0 : index
    %12 = vector.load %arg5[%c1, %c0_10] : memref<8x128xf32, #tpu.memory_space<vmem>>, vector<1x128xf32>
    %cst_11 = arith.constant dense<0xFF800000> : vector<128xf32>
    %13 = vector.multi_reduction <maximumf>, %4, %cst_11 [0] : vector<4x128xf32> to vector<128xf32>
    %14 = vector.shape_cast %13 : vector<128xf32> to vector<1x128xf32>
    %15 = arith.maximumf %12, %14 : vector<1x128xf32>
    %c1_12 = arith.constant 1 : index
    %c0_13 = arith.constant 0 : index
    %16 = vector.load %arg5[%c1_12, %c0_13] : memref<8x128xf32, #tpu.memory_space<vmem>>, vector<1x128xf32>
    tpu.vector_store %arg5[%c1_12, %c0_13], %15 {strides = array<i32>} : memref<8x128xf32, #tpu.memory_space<vmem>>, vector<1x128xf32>,
    %c2 = arith.constant 2 : index
    %c0_14 = arith.constant 0 : index
    %17 = vector.load %arg5[%c2, %c0_14] : memref<8x128xf32, #tpu.memory_space<vmem>>, vector<1x128xf32>
    %cst_15 = arith.constant dense<0x7F800000> : vector<128xf32>
    %18 = vector.multi_reduction <minimumf>, %6, %cst_15 [0] : vector<4x128xf32> to vector<128xf32>
    %19 = vector.shape_cast %18 : vector<128xf32> to vector<1x128xf32>
    %20 = arith.minimumf %17, %19 : vector<1x128xf32>
    %c2_16 = arith.constant 2 : index
    %c0_17 = arith.constant 0 : index
    %21 = vector.load %arg5[%c2_16, %c0_17] : memref<8x128xf32, #tpu.memory_space<vmem>>, vector<1x128xf32>
    tpu.vector_store %arg5[%c2_16, %c0_17], %20 {strides = array<i32>} : memref<8x128xf32, #tpu.memory_space<vmem>>, vector<1x128xf32>,
    %c3 = arith.constant 3 : index
    %c0_18 = arith.constant 0 : index
    %22 = vector.load %arg5[%c3, %c0_18] : memref<8x128xf32, #tpu.memory_space<vmem>>, vector<1x128xf32>
    %cst_19 = arith.constant dense<0xFF800000> : vector<128xf32>
    %23 = vector.multi_reduction <maximumf>, %6, %cst_19 [0] : vector<4x128xf32> to vector<128xf32>
    %24 = vector.shape_cast %23 : vector<128xf32> to vector<1x128xf32>
    %25 = arith.maximumf %22, %24 : vector<1x128xf32>
    %c3_20 = arith.constant 3 : index
    %c0_21 = arith.constant 0 : index
    %26 = vector.load %arg5[%c3_20, %c0_21] : memref<8x128xf32, #tpu.memory_space<vmem>>, vector<1x128xf32>
    tpu.vector_store %arg5[%c3_20, %c0_21], %25 {strides = array<i32>} : memref<8x128xf32, #tpu.memory_space<vmem>>, vector<1x128xf32>,
    %c0_22 = arith.constant 0 : index
    %c0_23 = arith.constant 0 : index
    %27 = vector.load %arg6[%c0_22, %c0_23] : memref<8x128xf32, #tpu.memory_space<vmem>>, vector<1x128xf32>
    %cst_24 = arith.constant dense<0.000000e+00> : vector<128xf32>
    %28 = vector.multi_reduction <add>, %4, %cst_24 [0] : vector<4x128xf32> to vector<128xf32>
    %29 = vector.shape_cast %28 : vector<128xf32> to vector<1x128xf32>
    %30 = arith.addf %27, %29 : vector<1x128xf32>
    %c0_25 = arith.constant 0 : index
    %c0_26 = arith.constant 0 : index
    %31 = vector.load %arg6[%c0_25, %c0_26] : memref<8x128xf32, #tpu.memory_space<vmem>>, vector<1x128xf32>
    tpu.vector_store %arg6[%c0_25, %c0_26], %30 {strides = array<i32>} : memref<8x128xf32, #tpu.memory_space<vmem>>, vector<1x128xf32>,
    %c1_27 = arith.constant 1 : index
    %c0_28 = arith.constant 0 : index
    %32 = vector.load %arg6[%c1_27, %c0_28] : memref<8x128xf32, #tpu.memory_space<vmem>>, vector<1x128xf32>
    %cst_29 = arith.constant dense<0.000000e+00> : vector<128xf32>
    %33 = vector.multi_reduction <add>, %6, %cst_29 [0] : vector<4x128xf32> to vector<128xf32>
    %34 = vector.shape_cast %33 : vector<128xf32> to vector<1x128xf32>
    %35 = arith.addf %32, %34 : vector<1x128xf32>
    %c1_30 = arith.constant 1 : index
    %c0_31 = arith.constant 0 : index
    %36 = vector.load %arg6[%c1_30, %c0_31] : memref<8x128xf32, #tpu.memory_space<vmem>>, vector<1x128xf32>
    tpu.vector_store %arg6[%c1_30, %c0_31], %35 {strides = array<i32>} : memref<8x128xf32, #tpu.memory_space<vmem>>, vector<1x128xf32>,
    %c2_32 = arith.constant 2 : index
    %c0_33 = arith.constant 0 : index
    %37 = vector.load %arg6[%c2_32, %c0_33] : memref<8x128xf32, #tpu.memory_space<vmem>>, vector<1x128xf32>
    %38 = arith.mulf %4, %4 : vector<4x128xf32>
    %cst_34 = arith.constant dense<0.000000e+00> : vector<128xf32>
    %39 = vector.multi_reduction <add>, %38, %cst_34 [0] : vector<4x128xf32> to vector<128xf32>
    %40 = vector.shape_cast %39 : vector<128xf32> to vector<1x128xf32>
    %41 = arith.addf %37, %40 : vector<1x128xf32>
    %c2_35 = arith.constant 2 : index
    %c0_36 = arith.constant 0 : index
    %42 = vector.load %arg6[%c2_35, %c0_36] : memref<8x128xf32, #tpu.memory_space<vmem>>, vector<1x128xf32>
    tpu.vector_store %arg6[%c2_35, %c0_36], %41 {strides = array<i32>} : memref<8x128xf32, #tpu.memory_space<vmem>>, vector<1x128xf32>,
    %c3_37 = arith.constant 3 : index
    %c0_38 = arith.constant 0 : index
    %43 = vector.load %arg6[%c3_37, %c0_38] : memref<8x128xf32, #tpu.memory_space<vmem>>, vector<1x128xf32>
    %44 = arith.mulf %6, %6 : vector<4x128xf32>
    %cst_39 = arith.constant dense<0.000000e+00> : vector<128xf32>
    %45 = vector.multi_reduction <add>, %44, %cst_39 [0] : vector<4x128xf32> to vector<128xf32>
    %46 = vector.shape_cast %45 : vector<128xf32> to vector<1x128xf32>
    %47 = arith.addf %43, %46 : vector<1x128xf32>
    %c3_40 = arith.constant 3 : index
    %c0_41 = arith.constant 0 : index
    %48 = vector.load %arg6[%c3_40, %c0_41] : memref<8x128xf32, #tpu.memory_space<vmem>>, vector<1x128xf32>
    tpu.vector_store %arg6[%c3_40, %c0_41], %47 {strides = array<i32>} : memref<8x128xf32, #tpu.memory_space<vmem>>, vector<1x128xf32>,
    %c4 = arith.constant 4 : index
    %c0_42 = arith.constant 0 : index
    %49 = vector.load %arg6[%c4, %c0_42] : memref<8x128xf32, #tpu.memory_space<vmem>>, vector<1x128xf32>
    %50 = arith.mulf %4, %6 : vector<4x128xf32>
    %cst_43 = arith.constant dense<0.000000e+00> : vector<128xf32>
    %51 = vector.multi_reduction <add>, %50, %cst_43 [0] : vector<4x128xf32> to vector<128xf32>
    %52 = vector.shape_cast %51 : vector<128xf32> to vector<1x128xf32>
    %53 = arith.addf %49, %52 : vector<1x128xf32>
    %c4_44 = arith.constant 4 : index
    %c0_45 = arith.constant 0 : index
    %54 = vector.load %arg6[%c4_44, %c0_45] : memref<8x128xf32, #tpu.memory_space<vmem>>, vector<1x128xf32>
    tpu.vector_store %arg6[%c4_44, %c0_45], %53 {strides = array<i32>} : memref<8x128xf32, #tpu.memory_space<vmem>>, vector<1x128xf32>,
    %c0_i32_46 = arith.constant 0 : i32
    %55 = arith.cmpi eq, %arg1, %c0_i32_46 : i32
    %56 = arith.extui %55 : i1 to i32
    %c0_i32_47 = arith.constant 0 : i32
    %57 = arith.cmpi ne, %56, %c0_i32_47 : i32
    scf.if %57 {
      %c0_48 = arith.constant 0 : index
      %c0_49 = arith.constant 0 : index
      %58 = vector.load %arg5[%c0_48, %c0_49] : memref<8x128xf32, #tpu.memory_space<vmem>>, vector<1x128xf32>
      %59 = vector.shape_cast %58 : vector<1x128xf32> to vector<1x1x128xf32>
      %cst_50 = arith.constant dense<0x7F800000> : vector<1xf32>
      %60 = vector.multi_reduction <minimumf>, %59, %cst_50 [1, 2] : vector<1x1x128xf32> to vector<1xf32>
      %61 = vector.shape_cast %60 : vector<1xf32> to vector<1x1x1xf32>
      %62 = vector.extract %61[0, 0, 0] : f32 from vector<1x1x1xf32>
      %c1_51 = arith.constant 1 : index
      %c0_52 = arith.constant 0 : index
      %63 = vector.load %arg5[%c1_51, %c0_52] : memref<8x128xf32, #tpu.memory_space<vmem>>, vector<1x128xf32>
      %64 = vector.shape_cast %63 : vector<1x128xf32> to vector<1x1x128xf32>
      %cst_53 = arith.constant dense<0xFF800000> : vector<1xf32>
      %65 = vector.multi_reduction <maximumf>, %64, %cst_53 [1, 2] : vector<1x1x128xf32> to vector<1xf32>
      %66 = vector.shape_cast %65 : vector<1xf32> to vector<1x1x1xf32>
      %67 = vector.extract %66[0, 0, 0] : f32 from vector<1x1x1xf32>
      %c2_54 = arith.constant 2 : index
      %c0_55 = arith.constant 0 : index
      %68 = vector.load %arg5[%c2_54, %c0_55] : memref<8x128xf32, #tpu.memory_space<vmem>>, vector<1x128xf32>
      %69 = vector.shape_cast %68 : vector<1x128xf32> to vector<1x1x128xf32>
      %cst_56 = arith.constant dense<0x7F800000> : vector<1xf32>
      %70 = vector.multi_reduction <minimumf>, %69, %cst_56 [1, 2] : vector<1x1x128xf32> to vector<1xf32>
      %71 = vector.shape_cast %70 : vector<1xf32> to vector<1x1x1xf32>
      %72 = vector.extract %71[0, 0, 0] : f32 from vector<1x1x1xf32>
      %c3_57 = arith.constant 3 : index
      %c0_58 = arith.constant 0 : index
      %73 = vector.load %arg5[%c3_57, %c0_58] : memref<8x128xf32, #tpu.memory_space<vmem>>, vector<1x128xf32>
      %74 = vector.shape_cast %73 : vector<1x128xf32> to vector<1x1x128xf32>
      %cst_59 = arith.constant dense<0xFF800000> : vector<1xf32>
      %75 = vector.multi_reduction <maximumf>, %74, %cst_59 [1, 2] : vector<1x1x128xf32> to vector<1xf32>
      %76 = vector.shape_cast %75 : vector<1xf32> to vector<1x1x1xf32>
      %77 = vector.extract %76[0, 0, 0] : f32 from vector<1x1x1xf32>
      %c0_60 = arith.constant 0 : index
      %c0_61 = arith.constant 0 : index
      %78 = vector.load %arg6[%c0_60, %c0_61] : memref<8x128xf32, #tpu.memory_space<vmem>>, vector<1x128xf32>
      %79 = vector.shape_cast %78 : vector<1x128xf32> to vector<1x1x128xf32>
      %cst_62 = arith.constant dense<0.000000e+00> : vector<1xf32>
      %80 = vector.multi_reduction <add>, %79, %cst_62 [1, 2] : vector<1x1x128xf32> to vector<1xf32>
      %81 = vector.shape_cast %80 : vector<1xf32> to vector<1x1x1xf32>
      %82 = vector.extract %81[0, 0, 0] : f32 from vector<1x1x1xf32>
      %c1_63 = arith.constant 1 : index
      %c0_64 = arith.constant 0 : index
      %83 = vector.load %arg6[%c1_63, %c0_64] : memref<8x128xf32, #tpu.memory_space<vmem>>, vector<1x128xf32>
      %84 = vector.shape_cast %83 : vector<1x128xf32> to vector<1x1x128xf32>
      %cst_65 = arith.constant dense<0.000000e+00> : vector<1xf32>
      %85 = vector.multi_reduction <add>, %84, %cst_65 [1, 2] : vector<1x1x128xf32> to vector<1xf32>
      %86 = vector.shape_cast %85 : vector<1xf32> to vector<1x1x1xf32>
      %87 = vector.extract %86[0, 0, 0] : f32 from vector<1x1x1xf32>
      %c2_66 = arith.constant 2 : index
      %c0_67 = arith.constant 0 : index
      %88 = vector.load %arg6[%c2_66, %c0_67] : memref<8x128xf32, #tpu.memory_space<vmem>>, vector<1x128xf32>
      %89 = vector.shape_cast %88 : vector<1x128xf32> to vector<1x1x128xf32>
      %cst_68 = arith.constant dense<0.000000e+00> : vector<1xf32>
      %90 = vector.multi_reduction <add>, %89, %cst_68 [1, 2] : vector<1x1x128xf32> to vector<1xf32>
      %91 = vector.shape_cast %90 : vector<1xf32> to vector<1x1x1xf32>
      %92 = vector.extract %91[0, 0, 0] : f32 from vector<1x1x1xf32>
      %c3_69 = arith.constant 3 : index
      %c0_70 = arith.constant 0 : index
      %93 = vector.load %arg6[%c3_69, %c0_70] : memref<8x128xf32, #tpu.memory_space<vmem>>, vector<1x128xf32>
      %94 = vector.shape_cast %93 : vector<1x128xf32> to vector<1x1x128xf32>
      %cst_71 = arith.constant dense<0.000000e+00> : vector<1xf32>
      %95 = vector.multi_reduction <add>, %94, %cst_71 [1, 2] : vector<1x1x128xf32> to vector<1xf32>
      %96 = vector.shape_cast %95 : vector<1xf32> to vector<1x1x1xf32>
      %97 = vector.extract %96[0, 0, 0] : f32 from vector<1x1x1xf32>
      %c4_72 = arith.constant 4 : index
      %c0_73 = arith.constant 0 : index
      %98 = vector.load %arg6[%c4_72, %c0_73] : memref<8x128xf32, #tpu.memory_space<vmem>>, vector<1x128xf32>
      %99 = vector.shape_cast %98 : vector<1x128xf32> to vector<1x1x128xf32>
      %cst_74 = arith.constant dense<0.000000e+00> : vector<1xf32>
      %100 = vector.multi_reduction <add>, %99, %cst_74 [1, 2] : vector<1x1x128xf32> to vector<1xf32>
      %101 = vector.shape_cast %100 : vector<1xf32> to vector<1x1x1xf32>
      %102 = vector.extract %101[0, 0, 0] : f32 from vector<1x1x1xf32>
      %103 = arith.subf %67, %62 : f32
      %cst_75 = arith.constant 9.99999993E-9 : f32
      %104 = arith.addf %103, %cst_75 : f32
      %cst_76 = arith.constant 1.000000e+00 : f32
      %105 = arith.divf %cst_76, %104 : f32
      %106 = arith.subf %77, %72 : f32
      %cst_77 = arith.constant 9.99999993E-9 : f32
      %107 = arith.addf %106, %cst_77 : f32
      %cst_78 = arith.constant 1.000000e+00 : f32
      %108 = arith.divf %cst_78, %107 : f32
      %cst_79 = arith.constant 0.000000e+00 : f32
      %109 = arith.subf %cst_79, %62 : f32
      %110 = arith.mulf %109, %105 : f32
      %cst_80 = arith.constant 0.000000e+00 : f32
      %111 = arith.subf %cst_80, %72 : f32
      %112 = arith.mulf %111, %108 : f32
      %113 = arith.mulf %105, %105 : f32
      %114 = arith.mulf %113, %92 : f32
      %cst_81 = arith.constant 2.000000e+00 : f32
      %115 = arith.mulf %cst_81, %105 : f32
      %116 = arith.mulf %115, %110 : f32
      %117 = arith.mulf %116, %82 : f32
      %118 = arith.addf %114, %117 : f32
      %cst_82 = arith.constant 5.120000e+02 : f32
      %119 = arith.mulf %cst_82, %110 : f32
      %120 = arith.mulf %119, %110 : f32
      %121 = arith.addf %118, %120 : f32
      %122 = arith.mulf %108, %108 : f32
      %123 = arith.mulf %122, %97 : f32
      %cst_83 = arith.constant 2.000000e+00 : f32
      %124 = arith.mulf %cst_83, %108 : f32
      %125 = arith.mulf %124, %112 : f32
      %126 = arith.mulf %125, %87 : f32
      %127 = arith.addf %123, %126 : f32
      %cst_84 = arith.constant 5.120000e+02 : f32
      %128 = arith.mulf %cst_84, %112 : f32
      %129 = arith.mulf %128, %112 : f32
      %130 = arith.addf %127, %129 : f32
      %131 = arith.mulf %105, %108 : f32
      %132 = arith.mulf %131, %102 : f32
      %133 = arith.mulf %105, %112 : f32
      %134 = arith.mulf %133, %82 : f32
      %135 = arith.addf %132, %134 : f32
      %136 = arith.mulf %110, %108 : f32
      %137 = arith.mulf %136, %87 : f32
      %138 = arith.addf %135, %137 : f32
      %cst_85 = arith.constant 5.120000e+02 : f32
      %139 = arith.mulf %cst_85, %110 : f32
      %140 = arith.mulf %139, %112 : f32
      %141 = arith.addf %138, %140 : f32
      %142 = arith.addf %121, %130 : f32
      %cst_86 = arith.constant 2.000000e+00 : f32
      %143 = arith.mulf %cst_86, %141 : f32
      %144 = arith.subf %142, %143 : f32
      %cst_87 = arith.constant 0.000000e+00 : f32
      %145 = arith.maximumf %144, %cst_87 : f32
      %146 = vector.broadcast %145 : f32 to vector<1x8x128xf32>
      %c0_88 = arith.constant 0 : index
      %c0_89 = arith.constant 0 : index
      %c0_90 = arith.constant 0 : index
      %147 = vector.load %arg4[%c0_88, %c0_89, %c0_90] : memref<1x8x128xf32, #tpu.memory_space<vmem>>, vector<1x8x128xf32>
      tpu.vector_store %arg4[%c0_88, %c0_89, %c0_90], %146 {strides = array<i32>} : memref<1x8x128xf32, #tpu.memory_space<vmem>>, vector<1x8x128xf32>,
    } else {
    }
    return
  }
  func.func @transform_0(%arg0: i32, %arg1: i32) -> (i32, i32, i32) {
    %c0_i32 = arith.constant 0 : i32
    %c0_i32_0 = arith.constant 0 : i32
    return %arg0, %arg1, %c0_i32 : i32, i32, i32
  }
  func.func @transform_1(%arg0: i32, %arg1: i32) -> (i32, i32, i32) {
    %c0_i32 = arith.constant 0 : i32
    %c0_i32_0 = arith.constant 0 : i32
    return %arg0, %arg1, %c0_i32 : i32, i32, i32
  }
  func.func @transform_2(%arg0: i32, %arg1: i32) -> (i32, i32, i32) {
    %c0_i32 = arith.constant 0 : i32
    %c0_i32_0 = arith.constant 0 : i32
    %c0_i32_1 = arith.constant 0 : i32
    return %arg0, %c0_i32, %c0_i32_0 : i32, i32, i32
  }
}

</mosaic_0001>

<bundles_post_ra>
// kernel: tpu_custom_call.1
= control target key start
LH: loop header
LB: loop body
LE: loop exit
PB: predicated region body
PF: predicated region fallthrough
CT: control target
= control target key end

     0   :  { %s1080_s0 = inlined_call_operand.hbm [shape: f32[2,8,128], index: 0, kind: input, shape index: {}]   ;;  %s1081_s1 = inlined_call_operand.hbm [shape: f32[2,8,128], index: 1, kind: input, shape index: {}]   ;;  %s1082_s2 = inlined_call_operand.hbm [shape: f32[2,8,128], index: 2, kind: output, shape index: {}]  }
   0x1   :  { %1095 = sst [smem:[#allocation23_spill]] %s1080_s0 }
   0x2   :  { %1096 = sst [smem:[#allocation24_spill]] %s1081_s1 }
   0x3   :  { %1097 = sst [smem:[#allocation25_spill]] %s1082_s2 }
   0x4   :  { %7 = vsyncpa [#allocation5], 0 }
   0x5   :  { %9 = vsyncpa [#allocation5 + $0x1], 0 }
   0x6   :  { %10 = vsyncpa [#allocation8], 0 }
   0x7   :  { %12 = vsyncpa [#allocation8 + $0x1], 0 }
   0x8   :  { %13 = vsyncpa [#allocation6], 0 }
   0x9   :  { %15 = vsyncpa [#allocation6 + $0x1], 0  ;;  %s899_s9 = smov 0   ;;  %s901_s10 = smov 0  }
   0xa   :  { %s903_s11 = smov 0   ;;  %s905_s12 = smov 0  }
   0xb   :  { %s907_s13 = smov 0   ;;  %s909_s14 = smov 0  }
   0xc LB: > { %1098 = sst [smem:[#allocation13_spill]] %s858_s9  ;;  %s619_s15 = sadd.s32 4294967295, %s878_s14   ;;  %s878_s14 = sphi %s909_s14, %s21_s14   ;;  %s874_s13 = sphi %s907_s13, %s1125_s13   ;;  %s870_s12 = sphi %s905_s12, %s1124_s12   ;;  %s866_s11 = sphi %s903_s11, %s1123_s11   ;;  %s862_s10 = sphi %s901_s10, %s1122_s10   ;;  %s858_s9 = sphi %s899_s9, %s1121_s9  }
   0xd   : > { %1099 = sst [smem:[#allocation14_spill]] %s862_s10  ;;  %s620_s16 = sadd.s32 4294967294, %s878_s14  }
   0xe   : > { %1100 = sst [smem:[#allocation15_spill]] %s866_s11  ;;  %s33_s17 = sadd.s32 1, %s874_s13 }
   0xf   : > { %1101 = sst [smem:[#allocation16_spill]] %s874_s13  ;;  %s42_s18 = sadd.s32 1, %s866_s11 }
  0x10   : > { %1102 = sst [smem:[#allocation17_spill]] %s878_s14  ;;  %p35_p0 = scmp.ge.s32.totalorder %s33_s17, 2 }
  0x11   : > { %p49_p1 = scmp.ne.s32.totalorder %s866_s11, %s862_s10  ;;  %p50_p2 = scmp.eq.s32.totalorder %s878_s14, 0 }
  0x12   : > { %p55_p3 = scmp.ne.s32.totalorder %s862_s10, %s858_s9  ;;  %s1127_s17 = smov (%p35_p0, %s33_s17), 0 }
  0x13   : > { %1103 = sst [smem:[#allocation18_spill]] %s1127_s17  ;;  %p940_p4 = por %p50_p2, %p49_p1 }
  0x14   : > { %p56_p5 = scmp.eq.s32.totalorder %s619_s15, 0  ;;  %s37_s20 = ssub.s32 %s874_s13, %s1127_s17 }
  0x15   : > { %p107_p6 = scmp.eq.s32.totalorder %s619_s15, 1  ;;  %p40_p7 = scmp.eq.s32.totalorder %s37_s20, 0 }
  0x16   : > { %p946_p8 = por %p56_p5, %p55_p3  ;;  %p113_p10 = scmp.eq.s32.totalorder %s620_s16, 1 }
  0x17   : > { %p950_p9 = por %p107_p6, %p49_p1  ;;  %p622_p12 = scmp.ge.s32.totalorder %s878_s14, 2 }
  0x18   : > { %s955_s23 = scalar_select %p40_p7, %s866_s11, %s42_s18  }
  0x19   : > { %s1106_s22 = scalar_select %p950_p9, 1, 0 }
  0x1a   : > { %1108 = sst [smem:[#allocation20_spill]] %s955_s23  ;;  %p957_p11 = por %p113_p10, %p55_p3 }
  0x1b   : > { %1107 = sst [smem:[#allocation19_spill]] %s1106_s22  ;;  %p674_p13 = scmp.lt.s32.totalorder %s878_s14, 2 }
  0x1c   : > { %s1109_s24 = scalar_select %p957_p11, 1, 0 }
  0x1d   : > { %s133_s25 = sand.u32 1, %s866_s11   ;;  %s624_s27 = sshll.u32 %s874_s13, 3 }
  0x1e   : > { %1110 = sst [smem:[#allocation21_spill]] %s1109_s24  ;;  %s623_s26 = sshll.u32 %s133_s25, 3 }
  0x1f   : > { %s1111_s0 = sld [smem:[#allocation23_spill]]  ;;  %s137_s3 = scalar_lea.vmem [#allocation4], %s623_s26 }
  0x20   : > { %s146_s4 = sshll.u32 %s137_s3, 4  ;;  %p664_p0 = pnand %p674_p13, %p940_p4  ;;  %s147_s4 = int_to_ptr.vmem [resolvable:$true] %s146_s4 }
  0x21   : > { %p627_p1 = scmp.ge.s32.totalorder %s878_s14, 1  ;;  %p171_p2 = scmp.lt.s32.totalorder %s878_s14, 3 }
  0x22   : > { %s134_s6 = scalar_lea.sflag [#allocation5], %s133_s25  ;;  %s1112_s1 = sld [smem:[#allocation24_spill]] }
  0x23   : > { %p172_p3 = pnand %p627_p1, %p171_p2  ;;  %s157_s16 = scalar_lea.vmem [#allocation7], %s623_s26 }
  0x24   : > { %s166_s18 = sshll.u32 %s157_s16, 4  ;;  %s154_s28 = scalar_lea.sflag [#allocation8], %s133_s25  ;;  %s167_s18 = int_to_ptr.vmem [resolvable:$true] %s166_s18 }
  0x25   : > { %s142_s30 = scalar_lea.hbm %s1111_s0, %s624_s27 }
  0x26   : > { %s144_s5 = sshll.u32 %s142_s30, 4  ;;  %175 = sbr.rel (%p172_p3) target bundleno = 373 (0x175), region = 28  ;;  %s145_s5 = int_to_ptr.hbm [resolvable:$true] %s144_s5 }
  0x27   : > { %666 = dma.hbm_to_vmem [thread:$0]  (!%p664_p0), %s145_s5, 128, %s147_s4, %s134_s6  }
  0x28   : > { %s162_s15 = scalar_lea.hbm %s1112_s1, %s624_s27 }
  0x29   : > { %s164_s20 = sshll.u32 %s162_s15, 4  ;;  %s165_s20 = int_to_ptr.hbm [resolvable:$true] %s164_s20 }
  0x2a   : > { %669 = dma.hbm_to_vmem [thread:$0]  (!%p664_p0), %s165_s20, 128, %s167_s18, %s154_s28  }
  0x2b   : > { %s976_s19 = sand.u32 1, %s862_s10  }
  0x2c   : > { %1113 = sst [smem:[#allocation22_spill]] %s976_s19  ;;  %s979_s29 = sshll.u32 %s976_s19, 3 }
  0x2d   : > { %s178_s30 = scalar_lea.sflag [#allocation5], %s976_s19  ;;  %s181_s3 = scalar_lea.vmem [#allocation4], %s979_s29 }
  0x2e   : > { %845 = dma.done.wait (%p946_p8), %s178_s30, 128  }
  0x2f   : > { %847 = vsyncadd (%p946_p8), %s178_s30, 4294967168  ;;  %s188_s25 = scalar_lea.sflag [#allocation8], %s976_s19  ;;  %s191_s26 = scalar_lea.vmem [#allocation7], %s979_s29 }
  0x30   : > { %849 = dma.done.wait (%p946_p8), %s188_s25, 128  }
  0x31   : > { %851 = vsyncadd (%p946_p8), %s188_s25, 4294967168  ;;  %v880_v0 = vmov 3e+38   ;;  %v881_v1 = vmov -3e+38   ;;  %vm230_vm0 = vcmask 1043456  }
  0x32   : > { %224 = vst [vmem:[#allocation2 + $0x2] sm:$0x1] %v880_v0  ;;  %v228_v2 = vld [vmem:[%s191_s26] sm:$0xf]  ;;  %v993_v3 = vld [vmem:[%s181_s3] sm:$0xf] }
  0x33   : > { %222 = vst [vmem:[#allocation2] sm:$0x1] %v880_v0  ;;  %v251_v4 = vsel %vm230_vm0, %v228_v2, inf  ;;  %v231_v5 = vsel %vm230_vm0, %v993_v3, inf  ;;  %v261_v6 = vsel %vm230_vm0, %v228_v2, -inf  ;;  %v241_v7 = vsel %vm230_vm0, %v993_v3, -inf }
  0x34   : > { %225 = vst [vmem:[#allocation2 + $0x3] sm:$0x1] %v881_v1  ;;  %v252_v8 = vrot.slane %v251_v4, 4  ;;  %v232_v9 = vrot.slane %v231_v5, 4  ;;  %v262_v10 = vrot.slane %v261_v6, 4  ;;  %v242_v11 = vrot.slane %v241_v7, 4 }
  0x35   : > { %223 = vst [vmem:[#allocation2 + $0x1] sm:$0x1] %v881_v1  ;;  %v271_v12 = vsel %vm230_vm0, %v993_v3, 0.0  ;;  %v281_v13 = vsel %vm230_vm0, %v228_v2, 0.0  ;;  %v882_v18 = vmov 0.0   ;;  %v313_v21 = vmul.f32 %v228_v2, %v993_v3  ;;  %s632_s19 = sshll.u32 %s870_s12, 3 }
  0x36   : > { %v253_v14 = vmin.f32 %v251_v4, %v252_v8  ;;  %v233_v15 = vmin.f32 %v231_v5, %v232_v9  ;;  %v263_v16 = vmax.f32 %v261_v6, %v262_v10  ;;  %v243_v17 = vmax.f32 %v241_v7, %v242_v11  ;;  %226 = vst [vmem:[#allocation3] sm:$0xff] %v882_v18 }
  0x37   : > { %v272_v19 = vrot.slane %v271_v12, 4  ;;  %v282_v20 = vrot.slane %v281_v13, 4  ;;  %v314_v28 = vsel %vm230_vm0, %v313_v21, 0.0  ;;  %v302_v54 = vmul.f32 %v228_v2, %v228_v2 }
  0x38   : > { %v254_v22 = vrot.slane %v253_v14, 2  ;;  %v234_v23 = vrot.slane %v233_v15, 2  ;;  %v264_v24 = vrot.slane %v263_v16, 2  ;;  %v244_v25 = vrot.slane %v243_v17, 2 }
  0x39   : > { %v273_v26 = vadd.f32 %v272_v19, %v271_v12  ;;  %v283_v27 = vadd.f32 %v282_v20, %v281_v13  ;;  %v315_v35 = vrot.slane %v314_v28, 4  ;;  %v250_v36 = vld [vmem:[#allocation2 + $0x2] sm:$0x1]  ;;  %v303_v0 = vsel %vm230_vm0, %v302_v54, 0.0 }
  0x3a   : > { %v255_v29 = vmin.f32 %v253_v14, %v254_v22  ;;  %v235_v30 = vmin.f32 %v233_v15, %v234_v23  ;;  %v265_v31 = vmax.f32 %v263_v16, %v264_v24  ;;  %v245_v32 = vmax.f32 %v243_v17, %v244_v25  ;;  %v229_v41 = vld [vmem:[#allocation2] sm:$0x1] }
  0x3b   : > { %v274_v33 = vrot.slane %v273_v26, 2  ;;  %v284_v34 = vrot.slane %v283_v27, 2  ;;  %v260_v42 = vld [vmem:[#allocation2 + $0x3] sm:$0x1]  ;;  %v316_v46 = vadd.f32 %v315_v35, %v314_v28  ;;  %v304_v1 = vrot.slane %v303_v0, 4 }
  0x3c   : > { %v256_v37 = vrot.slane %v255_v29, 1  ;;  %v236_v38 = vrot.slane %v235_v30, 1  ;;  %v266_v39 = vrot.slane %v265_v31, 1  ;;  %v246_v40 = vrot.slane %v245_v32, 1  ;;  %v240_v43 = vld [vmem:[#allocation2 + $0x1] sm:$0x1] }
  0x3d   : > { %v275_v44 = vadd.f32 %v274_v33, %v273_v26  ;;  %v285_v45 = vadd.f32 %v284_v34, %v283_v27  ;;  %v317_v53 = vrot.slane %v316_v46, 2  ;;  %v270_v59 = vld [vmem:[#allocation3] sm:$0x1]  ;;  %v280_v60 = vld [vmem:[#allocation3 + $0x1] sm:$0x1]  ;;  %v291_v4 = vmul.f32 %v993_v3, %v993_v3 }
  0x3e   : > { %v257_v47 = vmin.f32 %v255_v29, %v256_v37  ;;  %v237_v48 = vmin.f32 %v235_v30, %v236_v38  ;;  %v267_v49 = vmax.f32 %v265_v31, %v266_v39  ;;  %v247_v50 = vmax.f32 %v245_v32, %v246_v40  ;;  %v312_v7 = vld [vmem:[#allocation3 + $0x4] sm:$0x1]  ;;  %v301_v21 = vld [vmem:[#allocation3 + $0x3] sm:$0x1]  ;;  %v290_v30 = vld [vmem:[#allocation3 + $0x2] sm:$0x1] }
  0x3f   : > { %v276_v51 = vrot.slane %v275_v44, 1  ;;  %v286_v52 = vrot.slane %v285_v45, 1  ;;  %v318_v63 = vadd.f32 %v317_v53, %v316_v46  ;;  %v305_v8 = vadd.f32 %v304_v1, %v303_v0 }
  0x40   : > { %v258_v55 = vmin.f32 %v250_v36, %v257_v47  ;;  %v238_v56 = vmin.f32 %v229_v41, %v237_v48  ;;  %v268_v57 = vmax.f32 %v260_v42, %v267_v49  ;;  %v248_v58 = vmax.f32 %v240_v43, %v247_v50 }
  0x41   : > { %v277_v61 = vadd.f32 %v276_v51, %v275_v44  ;;  %v287_v62 = vadd.f32 %v286_v52, %v285_v45  ;;  %v319_v2 = vrot.slane %v318_v63, 1  ;;  %v292_v9 = vsel %vm230_vm0, %v291_v4, 0.0 }
  0x42   : > { %259 = vst [vmem:[#allocation2 + $0x2] sm:$0x1] %v258_v55  ;;  %v293_v11 = vrot.slane %v292_v9, 4  ;;  %v306_v12 = vrot.slane %v305_v8, 2  ;;  %vm327_vm1 = vcmask 1040384  }
  0x43   : > { %239 = vst [vmem:[#allocation2] sm:$0x1] %v238_v56  ;;  %v278_v5 = vadd.f32 %v277_v61, %v270_v59  ;;  %v288_v6 = vadd.f32 %v287_v62, %v280_v60  ;;  %v320_v10 = vadd.f32 %v319_v2, %v318_v63 }
  0x44   : > { %269 = vst [vmem:[#allocation2 + $0x3] sm:$0x1] %v268_v57  ;;  %v294_v14 = vadd.f32 %v293_v11, %v292_v9  ;;  %v307_v15 = vadd.f32 %v306_v12, %v305_v8 }
  0x45   : > { %249 = vst [vmem:[#allocation2 + $0x1] sm:$0x1] %v248_v58  ;;  %v321_v13 = vadd.f32 %v320_v10, %v312_v7 }
  0x46   : > { %279 = vst [vmem:[#allocation3] sm:$0x1] %v278_v5  ;;  %v295_v16 = vrot.slane %v294_v14, 2  ;;  %v308_v19 = vrot.slane %v307_v15, 1 }
  0x47   : > { %289 = vst [vmem:[#allocation3 + $0x1] sm:$0x1] %v288_v6 }
  0x48   : > { %322 = vst [vmem:[#allocation3 + $0x4] sm:$0x1] %v321_v13  ;;  %v296_v22 = vadd.f32 %v295_v16, %v294_v14  ;;  %v309_v23 = vadd.f32 %v308_v19, %v307_v15 }
  0x49   : > { %v349_v3 = vld [vmem:[#allocation2 + $0x2] sm:$0x1] }
  0x4a   : > { %v350_v17 = vsel %vm327_vm1, %v349_v3, inf  ;;  %v326_v18 = vld [vmem:[#allocation2] sm:$0x1]  ;;  %v297_v26 = vrot.slane %v296_v22, 1  ;;  %v310_v29 = vadd.f32 %v309_v23, %v301_v21 }
  0x4b   : > { %351 = vmin.xlane.f32.xlu1 %v350_v17  ;;  %v328_v20 = vsel %vm327_vm1, %v326_v18, inf  ;;  %v360_v24 = vld [vmem:[#allocation2 + $0x3] sm:$0x1] }
  0x4c   : > { %329 = vmin.xlane.f32.xlu0 %v328_v20  ;;  %v338_v27 = vld [vmem:[#allocation2 + $0x1] sm:$0x1]  ;;  %v298_v31 = vadd.f32 %v297_v26, %v296_v22  ;;  %v361_v32 = vsel %vm327_vm1, %v360_v24, -inf  ;;  %311 = vst [vmem:[#allocation3 + $0x3] sm:$0x1] %v310_v29 }
  0x4d   : > { %v371_v25 = vld [vmem:[#allocation3] sm:$0x1]  ;;  %v339_v33 = vsel %vm327_vm1, %v338_v27, -inf }
  0x4e   : > { %v372_v28 = vsel %vm327_vm1, %v371_v25, 0.0  ;;  %v382_v34 = vld [vmem:[#allocation3 + $0x1] sm:$0x1]  ;;  %v299_v35 = vadd.f32 %v298_v31, %v290_v30 }
  0x4f   : > { %373 = vadd.xlane.f32.xlu2 %v372_v28  ;;  %v383_v36 = vsel %vm327_vm1, %v382_v34, 0.0  ;;  %v415_v39 = vld [vmem:[#allocation3 + $0x4] sm:$0x1] }
  0x50   : > { %300 = vst [vmem:[#allocation3 + $0x2] sm:$0x1] %v299_v35  ;;  %v416_v42 = vsel %vm327_vm1, %v415_v39, 0.0 }
  0x53   : > { %362 = vmax.xlane.f32.xlu1 %v361_v32  ;;  %v404_v37 = vld [vmem:[#allocation3 + $0x3] sm:$0x1] }
  0x54   : > { %340 = vmax.xlane.f32.xlu0 %v339_v33  ;;  %v405_v38 = vsel %vm327_vm1, %v404_v37, 0.0 }
  0x57   : > { %384 = vadd.xlane.f32.xlu2 %v383_v36  ;;  %v393_v40 = vld [vmem:[#allocation3 + $0x2] sm:$0x1] }
  0x58   : > { %v394_v41 = vsel %vm327_vm1, %v393_v40, 0.0 }
  0x5b   : > { %406 = vadd.xlane.f32.xlu1 %v405_v38 }
  0x5c   : > { %395 = vadd.xlane.f32.xlu0 %v394_v41 }
  0x5f   : > { %417 = vadd.xlane.f32.xlu2 %v416_v42 }
  0xbe   : > { %v352_v43 = vpop.xlane.xlu1 %351 }
  0xbf   : > { %v353_v44 = vrot.slane %v352_v43, 4  ;;  %v330_v45 = vpop.xlane.xlu0 %329 }
  0xc0   : > { %v331_v46 = vrot.slane %v330_v45, 4 }
  0xc1   : > { %v354_v48 = vmin.f32 %v352_v43, %v353_v44 }
  0xc2   : > { %v332_v47 = vmin.f32 %v330_v45, %v331_v46  ;;  %v374_v8 = vpop.xlane.xlu2 %373 }
  0xc3   : > { %v355_v52 = vrot.slane %v354_v48, 2  ;;  %v375_v9 = vrot.slane %v374_v8, 4 }
  0xc4   : > { %v333_v49 = vrot.slane %v332_v47, 2 }
  0xc5   : > { %v356_v61 = vmin.f32 %v354_v48, %v355_v52  ;;  %v376_v10 = vadd.f32 %v375_v9, %v374_v8 }
  0xc6   : > { %v363_v50 = vpop.xlane.xlu1 %362  ;;  %v334_v51 = vmin.f32 %v332_v47, %v333_v49 }
  0xc7   : > { %v364_v53 = vrot.slane %v363_v50, 4  ;;  %v341_v54 = vpop.xlane.xlu0 %340  ;;  %v357_v1 = vrot.slane %v356_v61, 1  ;;  %v377_v12 = vrot.slane %v376_v10, 2 }
  0xc8   : > { %v342_v55 = vrot.slane %v341_v54, 4  ;;  %v335_v56 = vrot.slane %v334_v51, 1 }
  0xc9   : > { %v365_v57 = vmax.f32 %v363_v50, %v364_v53  ;;  %v358_v7 = vmin.f32 %v356_v61, %v357_v1  ;;  %v378_v15 = vadd.f32 %v377_v12, %v376_v10 }
  0xca   : > { %v343_v58 = vmax.f32 %v341_v54, %v342_v55  ;;  %v336_v59 = vmin.f32 %v334_v51, %v335_v56  ;;  %v385_v11 = vpop.xlane.xlu2 %384 }
  0xcb   : > { %v366_v60 = vrot.slane %v365_v57, 2  ;;  %v386_v13 = vrot.slane %v385_v11, 4  ;;  %v379_v3 = vrot.slane %v378_v15, 1 }
  0xcc   : > { %v344_v62 = vrot.slane %v343_v58, 2  ;;  %635 = vpush %v336_v59 }
  0xcd   : > { %v367_v63 = vmax.f32 %v365_v57, %v366_v60  ;;  %v387_v14 = vadd.f32 %v386_v13, %v385_v11  ;;  %v380_v17 = vadd.f32 %v379_v3, %v378_v15 }
  0xce   : > { %v345_v0 = vmax.f32 %v343_v58, %v344_v62  ;;  %v407_v20 = vpop.xlane.xlu1 %406 }
  0xcf   : > { %v368_v4 = vrot.slane %v367_v63, 1  ;;  %v388_v16 = vrot.slane %v387_v14, 2  ;;  %v408_v22 = vrot.slane %v407_v20, 4  ;;  %v396_v23 = vpop.xlane.xlu0 %395 }
  0xd0   : > { %v346_v5 = vrot.slane %v345_v0, 1  ;;  %v397_v25 = vrot.slane %v396_v23, 4 }
  0xd1   : > { %v369_v2 = vmax.f32 %v367_v63, %v368_v4  ;;  %v389_v18 = vadd.f32 %v388_v16, %v387_v14  ;;  %v409_v27 = vadd.f32 %v408_v22, %v407_v20 }
  0xd2   : > { %v347_v6 = vmax.f32 %v345_v0, %v346_v5  ;;  %v418_v19 = vpop.xlane.xlu2 %417  ;;  %v398_v29 = vadd.f32 %v397_v25, %v396_v23 }
  0xd3   : > { %v419_v21 = vrot.slane %v418_v19, 4  ;;  %v390_v24 = vrot.slane %v389_v18, 1  ;;  %v410_v31 = vrot.slane %v409_v27, 2 }
  0xd4   : > { %637 = vpush %v347_v6  ;;  %v399_v32 = vrot.slane %v398_v29, 2 }
  0xd5   : > { %639 = vpush %v358_v7  ;;  %v420_v26 = vadd.f32 %v419_v21, %v418_v19  ;;  %v391_v28 = vadd.f32 %v390_v24, %v389_v18  ;;  %v411_v34 = vadd.f32 %v410_v31, %v409_v27 }
  0xd6   : > { %641 = vpush %v369_v2  ;;  %v400_v35 = vadd.f32 %v399_v32, %v398_v29 }
  0xd7   : > { %643 = vpush %v380_v17  ;;  %v421_v30 = vrot.slane %v420_v26, 2  ;;  %v412_v36 = vrot.slane %v411_v34, 1 }
  0xd8   : > { %645 = vpush %v391_v28  ;;  %v401_v38 = vrot.slane %v400_v35, 1 }
  0xd9   : > { %v422_v33 = vadd.f32 %v421_v30, %v420_v26  ;;  %v413_v39 = vadd.f32 %v412_v36, %v411_v34 }
  0xda   : > { %v402_v40 = vadd.f32 %v401_v38, %v400_v35 }
  0xdb   : > { %v423_v37 = vrot.slane %v422_v33, 1 }
  0xdc   : > { %647 = vpush %v402_v40 }
  0xdd   : > { %v424_v41 = vadd.f32 %v423_v37, %v422_v33  ;;  %649 = vpush %v413_v39 }
  0xdf   : > { %651 = vpush %v424_v41 }
  0xfd   : > { %s1019_s21 = spop %635 }
  0xfe   : > { %s462_s30 = ssub.f32 0.0, %s1019_s21 }
 0x105   : > { %s638_s27 = spop %637 }
 0x106   : > { %s426_s4 = ssub.f32 %s638_s27, %s1019_s21  ;;  %s1022_s5 = spop %639 }
 0x107   : > { %s642_s6 = spop %641 }
 0x108   : > { %s427_s7 = sadd.f32 1e-08, %s426_s4  ;;  %s1025_s16 = spop %643 }
 0x109   : > { %s444_s8 = ssub.f32 %s642_s6, %s1022_s5  ;;  %s1027_s18 = spop %645 }
 0x10a   : > { %v428_v42 = vstv %s427_s7  ;;  %s464_s7 = ssub.f32 0.0, %s1022_s5 }
 0x10b   : > { %728 = vrcp.f32 %v428_v42  ;;  %s445_s15 = sadd.f32 1e-08, %s444_s8  ;;  %v440_v49 = vand.u32 2147483648, %v428_v42  ;;  %v438_v51 = vand.u32 2147483647, %v428_v42  ;;  %vm434_vm3 = vweird.f32 %v428_v42 }
 0x10d   : > { %v446_v43 = vstv %s445_s15  ;;  %v441_v55 = vor.u32 1.1754944e-38, %v440_v49  ;;  %vm439_vm6 = vcmp.eq.f32.partialorder %v438_v51, 8.507059e+37  ;;  %s648_s20 = spop %647 }
 0x10e   : > { %730 = vrcp.f32 %v446_v43  ;;  %v458_v54 = vand.u32 2147483648, %v446_v43  ;;  %v456_v57 = vand.u32 2147483647, %v446_v43  ;;  %vm452_vm7 = vweird.f32 %v446_v43  ;;  %s650_s28 = spop %649 }
 0x110   : > { %v459_v61 = vor.u32 1.1754944e-38, %v458_v54  ;;  %vm457_vm9 = vcmp.eq.f32.partialorder %v456_v57, 8.507059e+37  ;;  %s652_s3 = spop %651 }
 0x111   : > { %v729_v44 = vpop.eup %728 }
 0x112   : > { %v430_v45 = vmul.f32 %v729_v44, %v428_v42  ;;  %vm435_vm2 = vweird.f32 %v729_v44 }
 0x113   : > { %vm436_vm4 = vmor %vm434_vm3, %vm435_vm2 }
 0x114   : > { %v731_v46 = vpop.eup %730  ;;  %v431_v47 = vsub.f32 1.0, %v430_v45 }
 0x115   : > { %v448_v48 = vmul.f32 %v731_v46, %v446_v43  ;;  %vm453_vm5 = vweird.f32 %v731_v46 }
 0x116   : > { %v432_v50 = vmul.f32 %v729_v44, %v431_v47  ;;  %vm454_vm8 = vmor %vm452_vm7, %vm453_vm5 }
 0x117   : > { %v449_v52 = vsub.f32 1.0, %v448_v48 }
 0x118   : > { %v433_v53 = vadd.f32 %v729_v44, %v432_v50 }
 0x119   : > { %v450_v56 = vmul.f32 %v731_v46, %v449_v52 }
 0x11a   : > { %v437_v58 = vsel %vm436_vm4, %v729_v44, %v433_v53 }
 0x11b   : > { %v442_v59 = vsel %vm439_vm6, %v441_v55, %v437_v58  ;;  %v451_v60 = vadd.f32 %v731_v46, %v450_v56 }
 0x11c   : > { %653 = vpush %v442_v59 }
 0x11d   : > { %v455_v62 = vsel %vm454_vm8, %v731_v46, %v451_v60 }
 0x11e   : > { %v460_v63 = vsel %vm457_vm9, %v459_v61, %v455_v62 }
 0x11f   : > { %655 = vpush %v460_v63 }
 0x14d   : > { %s654_s25 = spop %653 }
 0x14e   : > { %s1030_s26 = smul.f32 %s654_s25, %s462_s30 }
 0x14f   : > { %s466_s27 = smul.f32 %s654_s25, %s654_s25 }
 0x150   : > { %s468_s4 = smul.f32 2.0, %s654_s25  ;;  %s656_s6 = spop %655 }
 0x151   : > { %s467_s8 = smul.f32 %s648_s20, %s466_s27 }
 0x152   : > { %s469_s15 = smul.f32 %s468_s4, %s1030_s26 }
 0x153   : > { %s465_s0 = smul.f32 %s656_s6, %s464_s7 }
 0x154   : > { %s470_s1 = smul.f32 %s1025_s16, %s469_s15 }
 0x155   : > { %s472_s17 = smul.f32 512.0, %s1030_s26 }
 0x156   : > { %s475_s13 = smul.f32 %s656_s6, %s656_s6  ;;  %s471_s4 = sadd.f32 %s470_s1, %s467_s8 }
 0x157   : > { %s477_s21 = smul.f32 2.0, %s656_s6 }
 0x158   : > { %s476_s23 = smul.f32 %s650_s28, %s475_s13 }
 0x159   : > { %s478_s30 = smul.f32 %s477_s21, %s465_s0 }
 0x15a   : > { %s481_s11 = smul.f32 512.0, %s465_s0 }
 0x15b   : > { %s479_s10 = smul.f32 %s1027_s18, %s478_s30  ;;  %s1114_s30 = sld [smem:[#allocation22_spill]] }
 0x15c   : > { %s482_s14 = smul.f32 %s481_s11, %s465_s0 }
 0x15d   : > { %s484_s24 = smul.f32 %s656_s6, %s654_s25  ;;  %s480_s20 = sadd.f32 %s479_s10, %s476_s23 }
 0x15e   : > { %s486_s9 = smul.f32 %s654_s25, %s465_s0  ;;  %s1115_s10 = sld [smem:[#allocation25_spill]] }
 0x15f   : > { %s485_s5 = smul.f32 %s652_s3, %s484_s24  ;;  %s483_s13 = sadd.f32 %s482_s14, %s480_s20 }
 0x160   : > { %s487_s27 = smul.f32 %s1025_s16, %s486_s9 }
 0x161   : > { %s489_s7 = smul.f32 %s656_s6, %s1030_s26  ;;  %s217_s6 = scalar_lea.vmem [#allocation9], %s979_s29 }
 0x162   : > { %s488_s15 = sadd.f32 %s487_s27, %s485_s5  ;;  %s492_s22 = smul.f32 %s472_s17, %s465_s0 }
 0x163   : > { %s490_s2 = smul.f32 %s1027_s18, %s489_s7  ;;  %s513_s5 = sshll.u32 %s217_s6, 4  ;;  %s514_s5 = int_to_ptr.vmem [resolvable:$true] %s513_s5 }
 0x164   : > { %s473_s28 = smul.f32 %s472_s17, %s1030_s26  ;;  %s1116_s23 = smov %s1115_s10 }
 0x165   : > { %s491_s21 = sadd.f32 %s490_s2, %s488_s15  ;;  %s511_s9 = scalar_lea.hbm %s1115_s10, %s632_s19 }
 0x166   : > { %s474_s11 = sadd.f32 %s473_s28, %s471_s4  ;;  %s515_s27 = sshll.u32 %s511_s9, 4  ;;  %s516_s27 = int_to_ptr.hbm [resolvable:$true] %s515_s27 }
 0x167   : > { %s493_s25 = sadd.f32 %s492_s22, %s491_s21  ;;  %s883_s18 = smov 0.0  }
 0x168   : > { %s494_s16 = sadd.f32 %s483_s13, %s474_s11  ;;  %s501_s2 = scalar_lea.sflag [#allocation6], %s1114_s30 }
 0x169   : > { %s495_s1 = smul.f32 2.0, %s493_s25  ;;  %s806_s14 = sshra.s32 %s516_s27, 4  ;;  %s807_s14 = int_to_ptr.hbm [resolvable:$true] %s806_s14 }
 0x16a   : > { %s808_s17 = scalar_lea.hbm %s807_s14, 8  ;;  %s812_s29 = scalar_lea.hbm %s1116_s23, 16 }
 0x16b   : > { %s496_s0 = ssub.f32 %s494_s16, %s495_s1  ;;  %p809_p4 = scmp.ne.s32.totalorder %s807_s14, %s808_s17 }
 0x16c   : > { %p813_p7 = scmp.lt.s32.totalorder %s807_s14, %s1116_s23  ;;  %p814_p8 = scmp.lt.s32.totalorder %s812_s29, %s808_s17 }
 0x16d   : > { %s497_s12 = smax.f32 %s883_s18, %s496_s0  ;;  %p810_p5 = pnand %p809_p4, %p950_p9 }
 0x16e   : > { %v498_v0 = vstv %s497_s12  ;;  %p815_p10 = por %p814_p8, %p813_p7 }
 0x16f   : > { %499 = vst [vmem:[%s217_s6] sm:$0xff] %v498_v0  ;;  %p811_p6 = pneg %p810_p5 }
 0x171   : > { %p816_p13 = pnand %p815_p10, %p811_p6 }
 0x173   : > { %819 = shalt.err (!%p816_p13)
}
 0x174   : > { %661 = dma.vmem_to_hbm [thread:$0]  (%p950_p9), %s514_s5, 128, %s516_s27, %s501_s2  }
 0x175 PF: > { %s1118_s4 = sld [smem:[#allocation13_spill]]  ;;  %p671_p0 = pnand %p622_p12, %p957_p11 }
 0x176   : > { %s1120_s15 = sld [smem:[#allocation17_spill]] }
 0x177   : > { %p672_p1 = pneg %p671_p0 }
 0x17b   : > { %s527_s13 = sand.u32 1, %s1118_s4  }
 0x17c   : > { %s528_s28 = scalar_lea.sflag [#allocation6], %s527_s13 }
 0x17d   : > { %853 = dma.done.wait (%p672_p1), %s528_s28, 128  }
 0x17e   : > { %855 = vsyncadd (%p672_p1), %s528_s28, 4294967168  ;;  %s21_s14 = sadd.s32 1, %s1120_s15   ;;  %s1121_s9 = sld [smem:[#allocation14_spill]] }
 0x17f   : > { %p18_p2 = scmp.ge.s32.totalorder %s21_s14, 4   ;;  %s1122_s10 = sld [smem:[#allocation15_spill]] }
 0x180   : > { %s1123_s11 = sld [smem:[#allocation20_spill]] }
 0x181   : > { %s1124_s12 = sld [smem:[#allocation16_spill]]  ;;  %20 = sbr.rel (!%p18_p2) target bundleno = 12 (0xc), region = 94 }
 0x182   : > { %s1125_s13 = sld [smem:[#allocation18_spill]] }
 0x186   :  { %534 = vsyncpa [#allocation5], 1 }
 0x187   :  { %536 = vsyncpa [#allocation5 + $0x1], 1 }
 0x188   :  { %537 = vsyncpa [#allocation8], 1 }
 0x189   :  { %539 = vsyncpa [#allocation8 + $0x1], 1 }
 0x18a   :  { %540 = vsyncpa [#allocation6], 1 }
 0x18b   :  { %542 = vsyncpa [#allocation6 + $0x1], 1 }

</bundles_post_ra>
